<compile_context>
chip_gen: v5e
topology: v5e:2x2
jax: 0.10.0
libtpu: 0.0.40
codegen_flags: <defaults>
</compile_context>

<pallas_src>
import math

import jax
import jax.numpy as jnp
from jax.experimental import pallas as pl
from jax.experimental.pallas import tpu as pltpu


def _cross_attn_kernel(q_ref, k_ref, v_ref,
                       wq_ref, bq_ref, wk_ref, bk_ref, wv_ref, bv_ref,
                       o_ref, kp_ref, vp_ref):
    bt, tq, d = q_ref.shape
    sk = k_ref.shape[1]
    cdt = q_ref.dtype                      # MXU operand dtype (bf16 or f32)

    # ---- K/V projections: computed once per batch-tile.  The Sq grid axis is
    # "arbitrary", so this scratch persists across all i steps of one b-tile.
    @pl.when(pl.program_id(1) == 0)
    def _project_kv():
        k2 = k_ref[...].reshape(bt * sk, d)
        v2 = v_ref[...].reshape(bt * sk, d)
        kp = jnp.dot(k2, wk_ref[...], preferred_element_type=jnp.float32) + bk_ref[...]
        vp = jnp.dot(v2, wv_ref[...], preferred_element_type=jnp.float32) + bv_ref[...]
        kp_ref[...] = kp.astype(cdt).reshape(bt, sk, d)
        vp_ref[...] = vp.astype(cdt).reshape(bt, sk, d)

    # ---- Q projection (per Sq tile).  1/sqrt(d_model) is already folded into
    # Wq / bq by the wrapper, so no extra per-step scale multiply is needed.
    q2 = q_ref[...].reshape(bt * tq, d)
    qp = jnp.dot(q2, wq_ref[...], preferred_element_type=jnp.float32) + bq_ref[...]
    qp = qp.astype(cdt).reshape(bt, tq, d)

    # ---- scores: batched contraction of the last dims (no explicit kp.T).
    scores = jnp.einsum("bqd,bkd->bqk", qp, kp_ref[...],
                        preferred_element_type=jnp.float32)

    # ---- numerically stable softmax in f32 (matches F.softmax semantics).
    m = jnp.max(scores, axis=-1, keepdims=True)
    e = jnp.exp(scores - m)
    denom = jnp.sum(e, axis=-1, keepdims=True)
    probs = e * pl.reciprocal(denom, approx=True)   # EUP reciprocal, ~free slot

    # ---- attention output; low-precision operands, f32 accumulation.
    out = jnp.einsum("bqk,bkd->bqd", probs.astype(cdt), vp_ref[...],
                     preferred_element_type=jnp.float32)
    o_ref[...] = out.astype(o_ref.dtype)


def _device_tuning():
    """Generation-aware block_q cap, VMEM tiling budget and scoped-VMEM limit."""
    try:
        kind = jax.devices()[0].device_kind.lower()
    except Exception:
        kind = ""
    mib = 1024 * 1024
    if "v7" in kind or "7x" in kind:
        # 64 MiB physical VMEM / 32 MiB default scoped limit -> stay well below.
        return dict(block_q_cap=256, budget=24 * mib, vmem_limit=48 * mib)
    if "v6" in kind:
        # 128 MiB physical; 256-wide MXU -> big tiles pay off.
        return dict(block_q_cap=512, budget=56 * mib, vmem_limit=100 * mib)
    if "v5 lite" in kind or "v5e" in kind or "v5lite" in kind:
        # 128-wide MXU geometry; raise the 16 MiB default scoped limit.
        return dict(block_q_cap=128, budget=40 * mib, vmem_limit=96 * mib)
    return dict(block_q_cap=256, budget=32 * mib, vmem_limit=64 * mib)


def _vmem_estimate_bytes(bb, bq, sk, dp, itemsize):
    """Conservative per-step VMEM footprint (no buffer sharing assumed)."""
    f32 = 4
    dbl = 2  # BlockSpec double-buffering of pipelined blocks
    io = dbl * bb * (2 * bq + 2 * sk) * dp * itemsize        # q, out, k, v blocks
    wts = dbl * 3 * (dp * dp + dp) * itemsize                # W*, b* (const idx, still 2 bufs)
    scratch = 2 * bb * sk * dp * itemsize                    # persistent projected K / V
    proj_kv = 2 * bb * sk * dp * (f32 + itemsize)            # f32 acc + cast (i == 0 only)
    proj_q = bb * bq * dp * (f32 + itemsize)                 # f32 qp + cdt copy
    softmax = bb * bq * sk * (3 * f32 + itemsize)            # scores, e, probs (+ cdt cast)
    out_tmp = bb * bq * dp * f32
    return io + wts + scratch + proj_kv + proj_q + softmax + out_tmp


def _pick_block_q(sq, bb, sk, dp, itemsize, cap, budget):
    """Largest divisor of sq that is <= cap, a multiple of 8 (or sq itself),
    and fits the VMEM budget."""
    legal = sorted((c for c in range(1, sq + 1)
                    if sq % c == 0 and (c % 8 == 0 or c == sq)), reverse=True)
    for c in legal:
        if c <= cap and _vmem_estimate_bytes(bb, c, sk, dp, itemsize) <= budget:
            return c
    return legal[-1]


def _pick_block_b(b, bq, sk, dp, itemsize, budget):
    """Small block_b (attention matmuls lower to per-batch dot_generals anyway);
    keep >= 2 steps on the parallel b axis so v7x's two TensorCores get work."""
    if b % 2 == 0 and b // 2 >= 2 and _vmem_estimate_bytes(2, bq, sk, dp, itemsize) <= budget:
        return 2
    return 1


def cross_attention(q, k, v, wq, bq, wk, bk, wv, bv, *, block_b=None, block_q=None):
    """q: (B, Sq, D); k, v: (B, Sk, D).
    wq/wk/wv: (D, D) PyTorch nn.Linear weights (out, in); bq/bk/bv: (D,)."""
    B, Sq, D = q.shape
    Sk = k.shape[1]
    dtype = q.dtype
    itemsize = jnp.dtype(dtype).itemsize

    # Lane-dense layout: pad d_model up to a multiple of 128 so q/out tiles use
    # full vregs and unmasked stores (padded lanes are exactly zero end-to-end).
    Dp = max(128, ((D + 127) // 128) * 128)
    pad_d = Dp - D
    scale = 1.0 / math.sqrt(D)             # PyTorch divides by d_model ** 0.5

    def prep_w(w, s):
        # (out, in) -> (in, out); fold scale in f32 to limit rounding; zero-pad.
        wt = (w.astype(jnp.float32).T * s).astype(dtype)
        if pad_d:
            wt = jnp.pad(wt, ((0, pad_d), (0, pad_d)))
        return wt

    def prep_b(bvec, s):
        bp = (bvec.astype(jnp.float32) * s).astype(dtype)
        if pad_d:
            bp = jnp.pad(bp, (0, pad_d))
        return bp[None, :]

    wq_t, bq_p = prep_w(wq, scale), prep_b(bq, scale)   # scale folded into Wq / bq
    wk_t, bk_p = prep_w(wk, 1.0), prep_b(bk, 1.0)
    wv_t, bv_p = prep_w(wv, 1.0), prep_b(bv, 1.0)

    if pad_d:
        q_p = jnp.pad(q, ((0, 0), (0, 0), (0, pad_d)))
        k_p = jnp.pad(k, ((0, 0), (0, 0), (0, pad_d)))
        v_p = jnp.pad(v, ((0, 0), (0, 0), (0, pad_d)))
    else:
        q_p, k_p, v_p = q, k, v

    tune = _device_tuning()
    if block_q is None:
        block_q = _pick_block_q(Sq, 1, Sk, Dp, itemsize,
                                tune["block_q_cap"], tune["budget"])
    if block_b is None:
        block_b = _pick_block_b(B, block_q, Sk, Dp, itemsize, tune["budget"])

    grid = (B // block_b, Sq // block_q)

    grid_spec = pltpu.PrefetchScalarGridSpec(
        num_scalar_prefetch=0,
        grid=grid,
        in_specs=[
            pl.BlockSpec((block_b, block_q, Dp), lambda b, i: (b, i, 0)),  # q tile
            pl.BlockSpec((block_b, Sk, Dp), lambda b, i: (b, 0, 0)),       # k (resident over i)
            pl.BlockSpec((block_b, Sk, Dp), lambda b, i: (b, 0, 0)),       # v (resident over i)
            pl.BlockSpec((Dp, Dp), lambda b, i: (0, 0)),                   # Wq^T (scaled)
            pl.BlockSpec((1, Dp), lambda b, i: (0, 0)),                    # bq (scaled)
            pl.BlockSpec((Dp, Dp), lambda b, i: (0, 0)),                   # Wk^T
            pl.BlockSpec((1, Dp), lambda b, i: (0, 0)),                    # bk
            pl.BlockSpec((Dp, Dp), lambda b, i: (0, 0)),                   # Wv^T
            pl.BlockSpec((1, Dp), lambda b, i: (0, 0)),                    # bv
        ],
        out_specs=pl.BlockSpec((block_b, block_q, Dp), lambda b, i: (b, i, 0)),
        scratch_shapes=[
            pltpu.VMEM((block_b, Sk, Dp), dtype),   # projected K, persists over Sq tiles
            pltpu.VMEM((block_b, Sk, Dp), dtype),   # projected V, persists over Sq tiles
        ],
    )

    out = pl.pallas_call(
        _cross_attn_kernel,
        out_shape=jax.ShapeDtypeStruct((B, Sq, Dp), dtype),
        grid_spec=grid_spec,
        compiler_params=pltpu.CompilerParams(
            dimension_semantics=("parallel", "arbitrary"),
            vmem_limit_bytes=tune["vmem_limit"]),
    )(q_p, k_p, v_p, wq_t, bq_p, wk_t, bk_p, wv_t, bv_p)

    return out[..., :D] if pad_d else out


def _reference(q, k, v, wq, bq, wk, bk, wv, bv):
    d_model = q.shape[-1]
    qp = q @ wq.T + bq
    kp = k @ wk.T + bk
    vp = v @ wv.T + bv
    scores = jnp.einsum("bqd,bkd->bqk", qp, kp) / math.sqrt(d_model)
    probs = jax.nn.softmax(scores, axis=-1)
    return jnp.einsum("bqk,bkd->bqd", probs, vp)


if __name__ == "__main__":
    B, Sq, Sk, D = 2, 16, 16, 32   # small shapes; d_model = 32

    key = jax.random.PRNGKey(0)
    kq, kk, kv, kwq, kbq, kwk, kbk, kwv, kbv = jax.random.split(key, 9)

    q = jax.random.normal(kq, (B, Sq, D), dtype=jnp.float32)
    k = jax.random.normal(kk, (B, Sk, D), dtype=jnp.float32)
    v = jax.random.normal(kv, (B, Sk, D), dtype=jnp.float32)

    # nn.Linear(d_model, d_model): weight (out, in), bias (out,), PyTorch-style
    # uniform(-1/sqrt(D), 1/sqrt(D)) init.
    bound = 1.0 / math.sqrt(D)
    Wq = jax.random.uniform(kwq, (D, D), minval=-bound, maxval=bound, dtype=jnp.float32)
    bq = jax.random.uniform(kbq, (D,), minval=-bound, maxval=bound, dtype=jnp.float32)
    Wk = jax.random.uniform(kwk, (D, D), minval=-bound, maxval=bound, dtype=jnp.float32)
    bk = jax.random.uniform(kbk, (D,), minval=-bound, maxval=bound, dtype=jnp.float32)
    Wv = jax.random.uniform(kwv, (D, D), minval=-bound, maxval=bound, dtype=jnp.float32)
    bv = jax.random.uniform(kbv, (D,), minval=-bound, maxval=bound, dtype=jnp.float32)

    args = (q, k, v, Wq, bq, Wk, bk, Wv, bv)

    # f32 run (tight check; only the approximate softmax reciprocal loosens it).
    out = jax.block_until_ready(cross_attention(*args))
    ref = _reference(*args)
    assert out.shape == (B, Sq, D)
    assert jnp.allclose(out, ref, atol=2e-3, rtol=2e-3), \
        float(jnp.max(jnp.abs(out - ref)))

    # bf16 run: bf16 MXU operands with f32 accumulation — the high-throughput
    # path on all generations (fp8 on v7x is not a drop-in; bf16 is the safe path).
    args_bf16 = tuple(x.astype(jnp.bfloat16) for x in args)
    out_bf16 = jax.block_until_ready(cross_attention(*args_bf16))
    ref_bf16 = _reference(*(x.astype(jnp.float32) for x in args_bf16))
    assert out_bf16.dtype == jnp.bfloat16
    assert jnp.allclose(out_bf16.astype(jnp.float32), ref_bf16, atol=5e-2, rtol=5e-2), \
        float(jnp.max(jnp.abs(out_bf16.astype(jnp.float32) - ref_bf16)))

    print("KERNEL_OK")
</pallas_src>

<mosaic_0001>
module attributes {stable_mosaic.version = 11 : i64} {
  func.func @_cross_attn_kernel(%arg0: i32, %arg1: i32, %arg2: memref<1x16x128xf32, #tpu.memory_space<vmem>>, %arg3: memref<1x16x128xf32, #tpu.memory_space<vmem>>, %arg4: memref<1x16x128xf32, #tpu.memory_space<vmem>>, %arg5: memref<128x128xf32, #tpu.memory_space<vmem>>, %arg6: memref<1x128xf32, #tpu.memory_space<vmem>>, %arg7: memref<128x128xf32, #tpu.memory_space<vmem>>, %arg8: memref<1x128xf32, #tpu.memory_space<vmem>>, %arg9: memref<128x128xf32, #tpu.memory_space<vmem>>, %arg10: memref<1x128xf32, #tpu.memory_space<vmem>>, %arg11: memref<1x16x128xf32, #tpu.memory_space<vmem>>, %arg12: memref<1x16x128xf32, #tpu.memory_space<vmem>>, %arg13: memref<1x16x128xf32, #tpu.memory_space<vmem>>) attributes {dimension_semantics = [#tpu.dimension_semantics<parallel>, #tpu.dimension_semantics<arbitrary>], iteration_bounds = array<i64: 2, 1>, scalar_prefetch = 0 : i64, scratch_operands = 2 : i64, tpu.core_type = #tpu.core_type<tc>, window_params = [{transform_indices = @transform_0, window_bounds = array<i64: 1, 16, 128>}, {transform_indices = @transform_1, window_bounds = array<i64: 1, 16, 128>}, {transform_indices = @transform_2, window_bounds = array<i64: 1, 16, 128>}, {pipeline_mode = #tpu.pipeline_mode<synchronous>, transform_indices = @transform_3, window_bounds = array<i64: 128, 128>}, {pipeline_mode = #tpu.pipeline_mode<synchronous>, transform_indices = @transform_4, window_bounds = array<i64: 1, 128>}, {pipeline_mode = #tpu.pipeline_mode<synchronous>, transform_indices = @transform_5, window_bounds = array<i64: 128, 128>}, {pipeline_mode = #tpu.pipeline_mode<synchronous>, transform_indices = @transform_6, window_bounds = array<i64: 1, 128>}, {pipeline_mode = #tpu.pipeline_mode<synchronous>, transform_indices = @transform_7, window_bounds = array<i64: 128, 128>}, {pipeline_mode = #tpu.pipeline_mode<synchronous>, transform_indices = @transform_8, window_bounds = array<i64: 1, 128>}, {transform_indices = @transform_9, window_bounds = array<i64: 1, 16, 128>}]} {
    %c0_i32 = arith.constant 0 : i32
    %0 = arith.cmpi eq, %arg1, %c0_i32 : i32
    %1 = arith.extui %0 : i1 to i32
    %c0_i32_0 = arith.constant 0 : i32
    %2 = arith.cmpi ne, %1, %c0_i32_0 : i32
    scf.if %2 {
      %c0_20 = arith.constant 0 : index
      %c0_21 = arith.constant 0 : index
      %c0_22 = arith.constant 0 : index
      %26 = vector.load %arg3[%c0_20, %c0_21, %c0_22] : memref<1x16x128xf32, #tpu.memory_space<vmem>>, vector<1x16x128xf32>
      %27 = vector.shape_cast %26 : vector<1x16x128xf32> to vector<16x128xf32>
      %c0_23 = arith.constant 0 : index
      %c0_24 = arith.constant 0 : index
      %c0_25 = arith.constant 0 : index
      %28 = vector.load %arg4[%c0_23, %c0_24, %c0_25] : memref<1x16x128xf32, #tpu.memory_space<vmem>>, vector<1x16x128xf32>
      %29 = vector.shape_cast %28 : vector<1x16x128xf32> to vector<16x128xf32>
      %c0_26 = arith.constant 0 : index
      %c0_27 = arith.constant 0 : index
      %30 = vector.load %arg7[%c0_26, %c0_27] : memref<128x128xf32, #tpu.memory_space<vmem>>, vector<128x128xf32>
      %cst_28 = arith.constant dense<0.000000e+00> : vector<16x128xf32>
      %31 = tpu.matmul %27, %30, %cst_28 {dimension_numbers = #tpu.dot_dimension_numbers<[1], [0], [0], [1], [0, 0, 1, 1], [], []>} : vector<16x128xf32>, vector<128x128xf32>, vector<16x128xf32> -> vector<16x128xf32>
      %c0_29 = arith.constant 0 : index
      %c0_30 = arith.constant 0 : index
      %32 = vector.load %arg8[%c0_29, %c0_30] : memref<1x128xf32, #tpu.memory_space<vmem>>, vector<1x128xf32>
      %33 = vector.broadcast %32 : vector<1x128xf32> to vector<16x128xf32>
      %34 = arith.addf %31, %33 : vector<16x128xf32>
      %c0_31 = arith.constant 0 : index
      %c0_32 = arith.constant 0 : index
      %35 = vector.load %arg9[%c0_31, %c0_32] : memref<128x128xf32, #tpu.memory_space<vmem>>, vector<128x128xf32>
      %cst_33 = arith.constant dense<0.000000e+00> : vector<16x128xf32>
      %36 = tpu.matmul %29, %35, %cst_33 {dimension_numbers = #tpu.dot_dimension_numbers<[1], [0], [0], [1], [0, 0, 1, 1], [], []>} : vector<16x128xf32>, vector<128x128xf32>, vector<16x128xf32> -> vector<16x128xf32>
      %c0_34 = arith.constant 0 : index
      %c0_35 = arith.constant 0 : index
      %37 = vector.load %arg10[%c0_34, %c0_35] : memref<1x128xf32, #tpu.memory_space<vmem>>, vector<1x128xf32>
      %38 = vector.broadcast %37 : vector<1x128xf32> to vector<16x128xf32>
      %39 = arith.addf %36, %38 : vector<16x128xf32>
      %40 = vector.shape_cast %34 : vector<16x128xf32> to vector<1x16x128xf32>
      %c0_36 = arith.constant 0 : index
      %c0_37 = arith.constant 0 : index
      %c0_38 = arith.constant 0 : index
      %41 = vector.load %arg12[%c0_36, %c0_37, %c0_38] : memref<1x16x128xf32, #tpu.memory_space<vmem>>, vector<1x16x128xf32>
      tpu.vector_store %arg12[%c0_36, %c0_37, %c0_38], %40 {strides = array<i32>} : memref<1x16x128xf32, #tpu.memory_space<vmem>>, vector<1x16x128xf32>,
      %42 = vector.shape_cast %39 : vector<16x128xf32> to vector<1x16x128xf32>
      %c0_39 = arith.constant 0 : index
      %c0_40 = arith.constant 0 : index
      %c0_41 = arith.constant 0 : index
      %43 = vector.load %arg13[%c0_39, %c0_40, %c0_41] : memref<1x16x128xf32, #tpu.memory_space<vmem>>, vector<1x16x128xf32>
      tpu.vector_store %arg13[%c0_39, %c0_40, %c0_41], %42 {strides = array<i32>} : memref<1x16x128xf32, #tpu.memory_space<vmem>>, vector<1x16x128xf32>,
    } else {
    }
    %c0 = arith.constant 0 : index
    %c0_1 = arith.constant 0 : index
    %c0_2 = arith.constant 0 : index
    %3 = vector.load %arg2[%c0, %c0_1, %c0_2] : memref<1x16x128xf32, #tpu.memory_space<vmem>>, vector<1x16x128xf32>
    %4 = vector.shape_cast %3 : vector<1x16x128xf32> to vector<16x128xf32>
    %c0_3 = arith.constant 0 : index
    %c0_4 = arith.constant 0 : index
    %5 = vector.load %arg5[%c0_3, %c0_4] : memref<128x128xf32, #tpu.memory_space<vmem>>, vector<128x128xf32>
    %cst = arith.constant dense<0.000000e+00> : vector<16x128xf32>
    %6 = tpu.matmul %4, %5, %cst {dimension_numbers = #tpu.dot_dimension_numbers<[1], [0], [0], [1], [0, 0, 1, 1], [], []>} : vector<16x128xf32>, vector<128x128xf32>, vector<16x128xf32> -> vector<16x128xf32>
    %c0_5 = arith.constant 0 : index
    %c0_6 = arith.constant 0 : index
    %7 = vector.load %arg6[%c0_5, %c0_6] : memref<1x128xf32, #tpu.memory_space<vmem>>, vector<1x128xf32>
    %8 = vector.broadcast %7 : vector<1x128xf32> to vector<16x128xf32>
    %9 = arith.addf %6, %8 : vector<16x128xf32>
    %10 = vector.shape_cast %9 : vector<16x128xf32> to vector<1x16x128xf32>
    %c0_7 = arith.constant 0 : index
    %c0_8 = arith.constant 0 : index
    %c0_9 = arith.constant 0 : index
    %11 = vector.load %arg12[%c0_7, %c0_8, %c0_9] : memref<1x16x128xf32, #tpu.memory_space<vmem>>, vector<1x16x128xf32>
    "tpu.trace_start"() <{level = 10 : i32, message = "bqd,bkd->bqk"}> : () -> ()
    %cst_10 = arith.constant dense<0.000000e+00> : vector<1x16x16xf32>
    %12 = tpu.matmul %10, %11, %cst_10 {dimension_numbers = #tpu.dot_dimension_numbers<[2], [2], [1], [1], [0, 0, 0, 1, 1, 1], [0], [0]>} : vector<1x16x128xf32>, vector<1x16x128xf32>, vector<1x16x16xf32> -> vector<1x16x16xf32>
    "tpu.trace_stop"() : () -> ()
    %cst_11 = arith.constant dense<0xFF800000> : vector<1x16xf32>
    %13 = vector.multi_reduction <maximumf>, %12, %cst_11 [2] : vector<1x16x16xf32> to vector<1x16xf32>
    %14 = vector.shape_cast %13 : vector<1x16xf32> to vector<1x16x1xf32>
    %15 = vector.broadcast %14 : vector<1x16x1xf32> to vector<1x16x16xf32>
    %16 = arith.subf %12, %15 : vector<1x16x16xf32>
    %17 = math.exp %16 : vector<1x16x16xf32>
    %cst_12 = arith.constant dense<0.000000e+00> : vector<1x16xf32>
    %18 = vector.multi_reduction <add>, %17, %cst_12 [2] : vector<1x16x16xf32> to vector<1x16xf32>
    %19 = vector.shape_cast %18 : vector<1x16xf32> to vector<1x16x1xf32>
    %20 = tpu.reciprocal %19 {approx = true} : vector<1x16x1xf32> -> vector<1x16x1xf32>
    %21 = vector.broadcast %20 : vector<1x16x1xf32> to vector<1x16x16xf32>
    %22 = arith.mulf %17, %21 : vector<1x16x16xf32>
    %c0_13 = arith.constant 0 : index
    %c0_14 = arith.constant 0 : index
    %c0_15 = arith.constant 0 : index
    %23 = vector.load %arg13[%c0_13, %c0_14, %c0_15] : memref<1x16x128xf32, #tpu.memory_space<vmem>>, vector<1x16x128xf32>
    "tpu.trace_start"() <{level = 10 : i32, message = "bqk,bkd->bqd"}> : () -> ()
    %cst_16 = arith.constant dense<0.000000e+00> : vector<1x16x128xf32>
    %24 = tpu.matmul %22, %23, %cst_16 {dimension_numbers = #tpu.dot_dimension_numbers<[2], [1], [1], [2], [0, 0, 0, 1, 1, 2], [0], [0]>} : vector<1x16x16xf32>, vector<1x16x128xf32>, vector<1x16x128xf32> -> vector<1x16x128xf32>
    "tpu.trace_stop"() : () -> ()
    %c0_17 = arith.constant 0 : index
    %c0_18 = arith.constant 0 : index
    %c0_19 = arith.constant 0 : index
    %25 = vector.load %arg11[%c0_17, %c0_18, %c0_19] : memref<1x16x128xf32, #tpu.memory_space<vmem>>, vector<1x16x128xf32>
    tpu.vector_store %arg11[%c0_17, %c0_18, %c0_19], %24 {strides = array<i32>} : memref<1x16x128xf32, #tpu.memory_space<vmem>>, vector<1x16x128xf32>,
    return
  }
  func.func @transform_0(%arg0: i32, %arg1: i32) -> (i32, i32, i32) {
    %c0_i32 = arith.constant 0 : i32
    %c0_i32_0 = arith.constant 0 : i32
    return %arg0, %arg1, %c0_i32 : i32, i32, i32
  }
  func.func @transform_1(%arg0: i32, %arg1: i32) -> (i32, i32, i32) {
    %c0_i32 = arith.constant 0 : i32
    %c0_i32_0 = arith.constant 0 : i32
    %c0_i32_1 = arith.constant 0 : i32
    return %arg0, %c0_i32, %c0_i32_0 : i32, i32, i32
  }
  func.func @transform_2(%arg0: i32, %arg1: i32) -> (i32, i32, i32) {
    %c0_i32 = arith.constant 0 : i32
    %c0_i32_0 = arith.constant 0 : i32
    %c0_i32_1 = arith.constant 0 : i32
    return %arg0, %c0_i32, %c0_i32_0 : i32, i32, i32
  }
  func.func @transform_3(%arg0: i32, %arg1: i32) -> (i32, i32) {
    %c0_i32 = arith.constant 0 : i32
    %c0_i32_0 = arith.constant 0 : i32
    %c0_i32_1 = arith.constant 0 : i32
    return %c0_i32, %c0_i32_0 : i32, i32
  }
  func.func @transform_4(%arg0: i32, %arg1: i32) -> (i32, i32) {
    %c0_i32 = arith.constant 0 : i32
    %c0_i32_0 = arith.constant 0 : i32
    %c0_i32_1 = arith.constant 0 : i32
    return %c0_i32, %c0_i32_0 : i32, i32
  }
  func.func @transform_5(%arg0: i32, %arg1: i32) -> (i32, i32) {
    %c0_i32 = arith.constant 0 : i32
    %c0_i32_0 = arith.constant 0 : i32
    %c0_i32_1 = arith.constant 0 : i32
    return %c0_i32, %c0_i32_0 : i32, i32
  }
  func.func @transform_6(%arg0: i32, %arg1: i32) -> (i32, i32) {
    %c0_i32 = arith.constant 0 : i32
    %c0_i32_0 = arith.constant 0 : i32
    %c0_i32_1 = arith.constant 0 : i32
    return %c0_i32, %c0_i32_0 : i32, i32
  }
  func.func @transform_7(%arg0: i32, %arg1: i32) -> (i32, i32) {
    %c0_i32 = arith.constant 0 : i32
    %c0_i32_0 = arith.constant 0 : i32
    %c0_i32_1 = arith.constant 0 : i32
    return %c0_i32, %c0_i32_0 : i32, i32
  }
  func.func @transform_8(%arg0: i32, %arg1: i32) -> (i32, i32) {
    %c0_i32 = arith.constant 0 : i32
    %c0_i32_0 = arith.constant 0 : i32
    %c0_i32_1 = arith.constant 0 : i32
    return %c0_i32, %c0_i32_0 : i32, i32
  }
  func.func @transform_9(%arg0: i32, %arg1: i32) -> (i32, i32, i32) {
    %c0_i32 = arith.constant 0 : i32
    %c0_i32_0 = arith.constant 0 : i32
    return %arg0, %arg1, %c0_i32 : i32, i32, i32
  }
}

</mosaic_0001>

<bundles_post_ra>
// kernel: tpu_custom_call.1
= control target key start
LH: loop header
LB: loop body
LE: loop exit
PB: predicated region body
PF: predicated region fallthrough
CT: control target
= control target key end

     0   :  { %s1641_s0 = inlined_call_operand.hbm [shape: f32[2,16,128], index: 0, kind: input, shape index: {}]   ;;  %s1642_s1 = inlined_call_operand.hbm [shape: f32[2,16,128], index: 1, kind: input, shape index: {}]   ;;  %s1643_s2 = inlined_call_operand.hbm [shape: f32[2,16,128], index: 2, kind: input, shape index: {}]   ;;  %s1644_s3 = inlined_call_operand.hbm [shape: f32[128,128], index: 3, kind: input, shape index: {}]   ;;  %s1645_s4 = inlined_call_operand.vmem [shape: f32[1,128], index: 4, kind: input, shape index: {}]   ;;  %s1646_s5 = inlined_call_operand.hbm [shape: f32[128,128], index: 5, kind: input, shape index: {}]   ;;  %s1647_s6 = inlined_call_operand.vmem [shape: f32[1,128], index: 6, kind: input, shape index: {}]   ;;  %s1648_s7 = inlined_call_operand.hbm [shape: f32[128,128], index: 7, kind: input, shape index: {}]   ;;  %s1649_s8 = inlined_call_operand.vmem [shape: f32[1,128], index: 8, kind: input, shape index: {}]   ;;  %s1650_s9 = inlined_call_operand.hbm [shape: f32[2,16,128], index: 9, kind: output, shape index: {}]  }
   0x1   :  { %1663 = sst [smem:[#allocation27_spill]] %s1642_s1 }
   0x2   :  { %1664 = sst [smem:[#allocation28_spill]] %s1644_s3 }
   0x3   :  { %1665 = sst [smem:[#allocation29_spill]] %s1646_s5 }
   0x4   :  { %1666 = sst [smem:[#allocation30_spill]] %s1648_s7 }
   0x5   :  { %1667 = sst [smem:[#allocation31_spill]] %s1650_s9 }
   0x6   :  { %14 = vsyncpa [#allocation5], 0 }
   0x7   :  { %16 = vsyncpa [#allocation5 + $0x1], 0 }
   0x8   :  { %17 = vsyncpa [#allocation8], 0 }
   0x9   :  { %19 = vsyncpa [#allocation8 + $0x1], 0 }
   0xa   :  { %20 = vsyncpa [#allocation11], 0 }
   0xb   :  { %21 = vsyncpa [#allocation14], 0 }
   0xc   :  { %22 = vsyncpa [#allocation6], 0 }
   0xd   :  { %24 = vsyncpa [#allocation6 + $0x1], 0  ;;  %s1391_s30 = smov 0   ;;  %s1393_s10 = smov 0  }
   0xe   :  { %s1395_s11 = smov 0   ;;  %s1397_s12 = smov 0  }
   0xf   :  { %s1399_s13 = smov 0   ;;  %s1401_s14 = smov 0  }
  0x10 LB: > { %1668 = sst [smem:[#allocation21_spill]] %s1312_s30  ;;  %s1422_s15 = sadd.s32 4294967295, %s1332_s14   ;;  %s1332_s14 = sphi %s1401_s14, %s30_s14   ;;  %s1328_s13 = sphi %s1399_s13, %s1693_s13   ;;  %s1324_s12 = sphi %s1397_s12, %s1692_s12   ;;  %s1320_s11 = sphi %s1395_s11, %s1696_s11   ;;  %s1316_s10 = sphi %s1393_s10, %s1695_s10   ;;  %s1312_s30 = sphi %s1391_s30, %s1694_s30  }
  0x11   : > { %1669 = sst [smem:[#allocation22_spill]] %s1328_s13  ;;  %s906_s16 = sadd.s32 4294967294, %s1332_s14  }
  0x12   : > { %1670 = sst [smem:[#allocation23_spill]] %s1332_s14  ;;  %p64_p0 = scmp.ne.s32.totalorder %s1316_s10, %s1312_s30 }
  0x13   : > { %p65_p1 = scmp.eq.s32.totalorder %s1422_s15, 0  ;;  %p268_p2 = scmp.eq.s32.totalorder %s1422_s15, 1 }
  0x14   : > { %p274_p3 = scmp.eq.s32.totalorder %s906_s16, 1  ;;  %p907_p5 = scmp.ge.s32.totalorder %s1332_s14, 1 }
  0x15   : > { %p1431_p4 = por %p65_p1, %p64_p0  ;;  %p281_p7 = scmp.lt.s32.totalorder %s1332_s14, 3 }
  0x16   : > { %p1436_p6 = por %p274_p3, %p64_p0  ;;  %s1674_s3 = sld [smem:[#allocation28_spill]] }
  0x17   : > { %p1444_p8 = pnand %p907_p5, %p281_p7  ;;  %s1334_s23 = smov [#allocation10]  }
  0x18   : > { %s1672_s18 = scalar_select %p1436_p6, 1, 0 }
  0x19   : > { %p960_p9 = pneg %p1444_p8  ;;  %s294_s24 = sshll.u32 %s1334_s23, 4  ;;  %s295_s24 = int_to_ptr.vmem [resolvable:$true] %s294_s24 }
  0x1a   : > { %1673 = sst [smem:[#allocation24_spill]] %s1672_s18  ;;  %p911_p11 = scmp.ge.s32.totalorder %s1332_s14, 2 }
  0x1b   : > { %p1452_p10 = pnand %p960_p9, %p65_p1  ;;  %s1651_s26 = smov 128  }
  0x1c   : > { %s292_s21 = sshll.u32 %s1674_s3, 4  ;;  %s1653_s27 = smov 8   ;;  %s293_s21 = int_to_ptr.hbm [resolvable:$true] %s292_s21 }
  0x1d   : > { %963 = dma.hbm_to_vmem [thread:$0]  (!%p1452_p10), %s293_s21, 2048, %s295_s24, [#allocation11], %s1651_s26, %s1651_s26, %s1653_s27  }
  0x1e   : > { %s42_s28 = sadd.s32 1, %s1328_s13  ;;  %s51_s29 = sadd.s32 1, %s1320_s11 }
  0x1f   : > { %p44_p12 = scmp.ge.s32.totalorder %s42_s28, 2  ;;  %p58_p13 = scmp.ne.s32.totalorder %s1320_s11, %s1316_s10 }
  0x20   : > { %p59_p0 = scmp.eq.s32.totalorder %s1332_s14, 0  ;;  %p987_p7 = scmp.lt.s32.totalorder %s1332_s14, 2 }
  0x21   : > { %s1698_s28 = smov (%p44_p12, %s42_s28), 0  ;;  %p1471_p5 = por %p268_p2, %p58_p13 }
  0x22   : > { %1677 = sst [smem:[#allocation25_spill]] %s1698_s28  ;;  %p60_p3 = por %p59_p0, %p58_p13 }
  0x23   : > { %s46_s19 = ssub.s32 %s1328_s13, %s1698_s28  ;;  %s1657_s20 = sand.u32 1, %s1320_s11  }
  0x24   : > { %p49_p9 = scmp.eq.s32.totalorder %s46_s19, 0  ;;  %s1481_s21 = sshll.u32 %s1657_s20, 4 }
  0x25   : > { %s1484_s23 = sshll.u32 %s1328_s13, 4  ;;  %p1489_p12 = pnand %p987_p7, %p60_p3 }
  0x26   : > { %s1487_s24 = scalar_select %p49_p9, %s1320_s11, %s51_s29  }
  0x27   : > { %s369_s27 = sand.u32 1, %s1332_s14   ;;  %s1681_s1 = sld [smem:[#allocation27_spill]] }
  0x28   : > { %1679 = sst [smem:[#allocation26_spill]] %s1487_s24  ;;  %s373_s20 = scalar_lea.vmem [#allocation7], %s1481_s21 }
  0x29   : > { %s381_s30 = sshll.u32 %s373_s20, 4  ;;  %s1499_s29 = scalar_lea.sflag [#allocation8], %s369_s27  ;;  %s382_s30 = int_to_ptr.vmem [resolvable:$true] %s381_s30 }
  0x2a   : > { %s1682_s13 = smov 8   ;;  %s1683_s24 = smov 128  }
  0x2b   : > { %s1684_s5 = sld [smem:[#allocation29_spill]]  ;;  %s1337_s28 = smov [#allocation12]  }
  0x2c   : > { %s311_s20 = sshll.u32 %s1337_s28, 4  ;;  %s1685_s7 = sld [smem:[#allocation30_spill]]  ;;  %s312_s20 = int_to_ptr.vmem [resolvable:$true] %s311_s20 }
  0x2d   : > { %s378_s19 = scalar_lea.hbm %s1681_s1, %s1484_s23  ;;  %s1338_s9 = smov [#allocation13]  }
  0x2e   : > { %s379_s18 = sshll.u32 %s378_s19, 4  ;;  %s349_s28 = scalar_lea.vmem [#allocation4], %s1481_s21  ;;  %s380_s18 = int_to_ptr.hbm [resolvable:$true] %s379_s18 }
  0x2f   : > { %976 = dma.hbm_to_vmem [thread:$0]  (!%p1489_p12), %s380_s18, 256, %s382_s30, %s1499_s29, %s1683_s24, %s1683_s24, %s1682_s13  }
  0x30   : > { %s328_s30 = sshll.u32 %s1338_s9, 4  ;;  %s356_s18 = scalar_lea.hbm %s1641_s0, %s1484_s23  ;;  %s329_s30 = int_to_ptr.vmem [resolvable:$true] %s328_s30 }
  0x31   : > { %s309_s3 = sshll.u32 %s1684_s5, 4  ;;  %s359_s19 = sshll.u32 %s349_s28, 4  ;;  %s310_s3 = int_to_ptr.hbm [resolvable:$true] %s309_s3  ;;  %s360_s19 = int_to_ptr.vmem [resolvable:$true] %s359_s19 }
  0x32   : > { %s326_s27 = sshll.u32 %s1685_s7, 4  ;;  %s357_s5 = sshll.u32 %s356_s18, 4  ;;  %s327_s27 = int_to_ptr.hbm [resolvable:$true] %s326_s27  ;;  %s358_s5 = int_to_ptr.hbm [resolvable:$true] %s357_s5 }
  0x33   : > { %966 = dma.hbm_to_vmem [thread:$0]  (!%p1452_p10), %s310_s3, 2048, %s312_s20, [#allocation11], %s1683_s24, %s1683_s24, %s1682_s13  }
  0x34   : > { %969 = dma.hbm_to_vmem [thread:$0]  (!%p1452_p10), %s327_s27, 2048, %s329_s30, [#allocation14], %s1683_s24, %s1683_s24, %s1682_s13  }
  0x35   : > { %s1686_s3 = sand.u32 1, %s1320_s11   ;;  %s400_s27 = scalar_lea.hbm %s1643_s2, %s1484_s23 }
  0x36   : > { %s346_s20 = scalar_lea.sflag [#allocation5], %s1686_s3  ;;  %s395_s30 = scalar_lea.vmem [#allocation9], %s1481_s21 }
  0x37   : > { %973 = dma.hbm_to_vmem [thread:$0]  (!%p1489_p12), %s358_s5, 256, %s360_s19, %s346_s20, %s1683_s24, %s1683_s24, %s1682_s13  }
  0x38   : > { %s403_s7 = sshll.u32 %s395_s30, 4  ;;  %s401_s1 = sshll.u32 %s400_s27, 4  ;;  %s404_s7 = int_to_ptr.vmem [resolvable:$true] %s403_s7  ;;  %s402_s1 = int_to_ptr.hbm [resolvable:$true] %s401_s1 }
  0x39   : > { %979 = dma.hbm_to_vmem [thread:$0]  (!%p1489_p12), %s402_s1, 256, %s404_s7, %s1499_s29, %s1683_s24, %s1683_s24, %s1682_s13  }
  0x3a   : > { %415 = sbr.rel (%p1444_p8) target bundleno = 776 (0x308), region = 56  ;;  %s1549_s5 = sand.u32 (!%p1444_p8), 1, %s1316_s10  }
  0x3b   : > { %s1552_s23 = sshll.u32 (!%p1444_p8), %s1549_s5, 4  ;;  %s418_s21 = scalar_lea.sflag (!%p1444_p8), [#allocation5], %s1549_s5 }
  0x3c   : > { %s421_s14 = scalar_lea.vmem (!%p1444_p8), [#allocation4], %s1552_s23 }
  0x3f   : > { %1291 = dma.done.wait (%p1431_p4), %s418_s21, 256  }
  0x40   : > { %1293 = vsyncadd (%p1431_p4), %s418_s21, 4294967040  ;;  %s427_s7 = sand.u32 1, %s1422_s15   ;;  %s431_s22 = scalar_lea.vmem [#allocation7], %s1552_s23 }
  0x41   : > { %s428_s13 = scalar_lea.sflag [#allocation8], %s427_s7 }
  0x42   : > { %1295 = dma.done.wait (%p1431_p4), %s428_s13, 512  }
  0x43   : > { %1297 = vsyncadd (%p1431_p4), %s428_s13, 4294966784  ;;  %s441_s26 = scalar_lea.vmem [#allocation9], %s1552_s23 }
  0x44   : > { %1299 = dma.done.wait (%p65_p1), [#allocation11], 4096  }
  0x45   : > { %1301 = vsyncadd (%p65_p1), [#allocation11], 4294963200 }
  0x46   : > { %1303 = dma.done.wait (%p65_p1), [#allocation14], 2048  }
  0x47   : > { %1305 = vsyncadd (%p65_p1), [#allocation14], 4294965248  ;;  %v527_v0 = vld [vmem:[#allocation12 + $0x78] sm:$0xff]  ;;  %v526_v1 = vld [vmem:[#allocation12 + $0x70] sm:$0xff]  ;;  %vm672_vm0 = vcmask 130048   ;;  %s939_s19 = sshll.u32 %s1324_s12, 4 }
  0x48   : > { %532 = vmatpush.msra.mxu0 %v527_v0  ;;  %v619_v2 = vld [vmem:[#allocation10 + $0x78] sm:$0xff]  ;;  %v525_v3 = vld [vmem:[#allocation12 + $0x68] sm:$0xff]  ;;  %v618_v4 = vld [vmem:[#allocation10 + $0x70] sm:$0xff]  ;;  %s1687_s25 = sld [smem:[#allocation31_spill]]  ;;  %s501_s27 = scalar_lea.vmem [#allocation15], %s1552_s23 }
  0x49   : > { %624 = vmatpush.msra.mxu2 %v619_v2  ;;  %v617_v5 = vld [vmem:[#allocation10 + $0x68] sm:$0xff]  ;;  %v524_v6 = vld [vmem:[#allocation12 + $0x60] sm:$0xff]  ;;  %v523_v8 = vld [vmem:[#allocation12 + $0x58] sm:$0xff]  ;;  %s743_s30 = sshll.u32 %s501_s27, 4  ;;  %s729_s21 = scalar_lea.sflag [#allocation6], %s1549_s5  ;;  %s744_s30 = int_to_ptr.vmem [resolvable:$true] %s743_s30 }
  0x4a   : > { %533 = vmatpush.msra.mxu0 %v526_v1  ;;  %v616_v7 = vld [vmem:[#allocation10 + $0x60] sm:$0xff]  ;;  %v615_v9 = vld [vmem:[#allocation10 + $0x58] sm:$0xff]  ;;  %v522_v10 = vld [vmem:[#allocation12 + $0x50] sm:$0xff] }
  0x4b   : > { %625 = vmatpush.msra.mxu2 %v618_v4  ;;  %v614_v11 = vld [vmem:[#allocation10 + $0x50] sm:$0xff]  ;;  %v521_v12 = vld [vmem:[#allocation12 + $0x48] sm:$0xff]  ;;  %v520_v14 = vld [vmem:[#allocation12 + $0x40] sm:$0xff] }
  0x4c   : > { %534 = vmatpush.msra.mxu0 %v525_v3  ;;  %v613_v13 = vld [vmem:[#allocation10 + $0x48] sm:$0xff]  ;;  %v612_v15 = vld [vmem:[#allocation10 + $0x40] sm:$0xff]  ;;  %v519_v16 = vld [vmem:[#allocation12 + $0x38] sm:$0xff] }
  0x4d   : > { %626 = vmatpush.msra.mxu2 %v617_v5  ;;  %v611_v17 = vld [vmem:[#allocation10 + $0x38] sm:$0xff]  ;;  %v518_v18 = vld [vmem:[#allocation12 + $0x30] sm:$0xff]  ;;  %v517_v20 = vld [vmem:[#allocation12 + $0x28] sm:$0xff] }
  0x4e   : > { %535 = vmatpush.msra.mxu0 %v524_v6  ;;  %v610_v19 = vld [vmem:[#allocation10 + $0x30] sm:$0xff]  ;;  %v609_v21 = vld [vmem:[#allocation10 + $0x28] sm:$0xff]  ;;  %v516_v22 = vld [vmem:[#allocation12 + $0x20] sm:$0xff]  ;;  %s742_s9 = scalar_lea.hbm %s1687_s25, %s939_s19 }
  0x4f   : > { %627 = vmatpush.msra.mxu2 %v616_v7  ;;  %v608_v23 = vld [vmem:[#allocation10 + $0x20] sm:$0xff]  ;;  %v515_v24 = vld [vmem:[#allocation12 + $0x18] sm:$0xff]  ;;  %v514_v26 = vld [vmem:[#allocation12 + $0x10] sm:$0xff]  ;;  %s745_s1 = sshll.u32 %s742_s9, 4  ;;  %s746_s1 = int_to_ptr.hbm [resolvable:$true] %s745_s1 }
  0x50   : > { %536 = vmatpush.msra.mxu0 %v523_v8  ;;  %v607_v25 = vld [vmem:[#allocation10 + $0x18] sm:$0xff]  ;;  %v606_v27 = vld [vmem:[#allocation10 + $0x10] sm:$0xff]  ;;  %v513_v28 = vld [vmem:[#allocation12 + $0x8] sm:$0xff] }
  0x51   : > { %628 = vmatpush.msra.mxu2 %v615_v9  ;;  %v605_v29 = vld [vmem:[#allocation10 + $0x8] sm:$0xff]  ;;  %v512_v30 = vld [vmem:[#allocation12] sm:$0xff]  ;;  %v570_v46 = vld [vmem:[#allocation13 + $0x78] sm:$0xff] }
  0x52   : > { %537 = vmatpush.msra.mxu0 %v522_v10  ;;  %v508_v31 = vld [vmem:[%s431_s22] sm:$0xff]  ;;  %v509_v34 = vld [vmem:[%s431_s22 + $0x8] sm:$0xff]  ;;  %575 = vmatpush.msra.mxu1 %v570_v46  ;;  %s1258_s22 = scalar_lea.hbm %s1687_s25, 32 }
  0x53   : > { %629 = vmatpush.msra.mxu2 %v614_v11  ;;  %v604_v32 = vld [vmem:[#allocation10] sm:$0xff]  ;;  %v603_v35 = vld [vmem:[%s421_s14 + $0x8] sm:$0xff]  ;;  %v569_v47 = vld [vmem:[#allocation13 + $0x70] sm:$0xff] }
  0x54   : > { %538 = vmatpush.msra.mxu0 %v521_v12  ;;  %v602_v33 = vld [vmem:[%s421_s14] sm:$0xff]  ;;  %v568_v48 = vld [vmem:[#allocation13 + $0x68] sm:$0xff]  ;;  %576 = vmatpush.msra.mxu1 %v569_v47  ;;  %v566_v50 = vld [vmem:[#allocation13 + $0x58] sm:$0xff]  ;;  %s1252_s14 = sshra.s32 %s746_s1, 4  ;;  %s1253_s14 = int_to_ptr.hbm [resolvable:$true] %s1252_s14 }
  0x55   : > { %630 = vmatpush.msra.mxu2 %v613_v13  ;;  %v1047_v37 = vld [vmem:[%s1647_s6] ss:$0 sm:$0xff]  ;;  %v565_v51 = vld [vmem:[#allocation13 + $0x50] sm:$0xff]  ;;  %v564_v52 = vld [vmem:[#allocation13 + $0x48] sm:$0xff]  ;;  %s1254_s7 = scalar_lea.hbm %s1253_s14, 16  ;;  %p1259_p8 = scmp.lt.s32.totalorder %s1253_s14, %s1687_s25 }
  0x56   : > { %539 = vmatpush.msra.mxu0 %v520_v14  ;;  %v1048_v41 = vld [vmem:[%s1645_s4] ss:$0 sm:$0xff]  ;;  %577 = vmatpush.msra.mxu1 %v568_v48  ;;  %v562_v54 = vld [vmem:[#allocation13 + $0x38] sm:$0xff]  ;;  %v561_v55 = vld [vmem:[#allocation13 + $0x30] sm:$0xff]  ;;  %p1255_p1 = scmp.ne.s32.totalorder %s1253_s14, %s1254_s7  ;;  %p1260_p10 = scmp.lt.s32.totalorder %s1258_s22, %s1254_s7 }
  0x57   : > { %631 = vmatpush.msra.mxu2 %v612_v15  ;;  %v567_v49 = vld [vmem:[#allocation13 + $0x60] sm:$0xff]  ;;  %v560_v56 = vld [vmem:[#allocation13 + $0x28] sm:$0xff]  ;;  %v558_v59 = vld [vmem:[#allocation13 + $0x18] sm:$0xff] }
  0x58   : > { %540 = vmatpush.msra.mxu0 %v519_v16  ;;  %578 = vmatpush.msra.mxu1 %v567_v49  ;;  %v563_v53 = vld [vmem:[#allocation13 + $0x40] sm:$0xff]  ;;  %v557_v61 = vld [vmem:[#allocation13 + $0x10] sm:$0xff]  ;;  %v556_v62 = vld [vmem:[#allocation13 + $0x8] sm:$0xff]  ;;  %p1256_p2 = pnand %p1255_p1, %p1471_p5  ;;  %p1261_p13 = por %p1260_p10, %p1259_p8 }
  0x59   : > { %632 = vmatpush.msra.mxu2 %v611_v17  ;;  %v559_v57 = vld [vmem:[#allocation13 + $0x20] sm:$0xff]  ;;  %v511_v3 = vld [vmem:[%s441_s26 + $0x8] sm:$0xff] }
  0x5a   : > { %541 = vmatpush.msra.mxu0 %v518_v18  ;;  %579 = vmatpush.msra.mxu1 %v566_v50  ;;  %v555_v63 = vld [vmem:[#allocation13] sm:$0xff]  ;;  %p1257_p4 = pneg %p1256_p2 }
  0x5b   : > { %633 = vmatpush.msra.mxu2 %v610_v19  ;;  %v510_v0 = vld [vmem:[%s441_s26] sm:$0xff] }
  0x5c   : > { %542 = vmatpush.msra.mxu0 %v517_v20  ;;  %580 = vmatpush.msra.mxu1 %v565_v51  ;;  %v1049_v15 = vld [vmem:[%s1649_s8] ss:$0 sm:$0xff]  ;;  %p1262_p0 = pnand %p1261_p13, %p1257_p4 }
  0x5d   : > { %634 = vmatpush.msra.mxu2 %v609_v21 }
  0x5e   : > { %543 = vmatpush.msra.mxu0 %v516_v22  ;;  %581 = vmatpush.msra.mxu1 %v564_v52 }
  0x5f   : > { %635 = vmatpush.msra.mxu2 %v608_v23 }
  0x60   : > { %544 = vmatpush.msra.mxu0 %v515_v24  ;;  %582 = vmatpush.msra.mxu1 %v563_v53 }
  0x61   : > { %636 = vmatpush.msra.mxu2 %v607_v25 }
  0x62   : > { %545 = vmatpush.msra.mxu0 %v514_v26  ;;  %583 = vmatpush.msra.mxu1 %v562_v54 }
  0x63   : > { %637 = vmatpush.msra.mxu2 %v606_v27 }
  0x64   : > { %546 = vmatpush.msra.mxu0 %v513_v28  ;;  %584 = vmatpush.msra.mxu1 %v561_v55 }
  0x65   : > { %638 = vmatpush.msra.mxu2 %v605_v29 }
  0x66   : > { %547 = vmatpush.msra.mxu0 %v512_v30  ;;  %585 = vmatpush.msra.mxu1 %v560_v56 }
  0x67   : > { %548 = vmatmul.f32.vlgmr.msra.gmra.mxu0 %v508_v31  ;;  %639 = vmatpush.msra.mxu2 %v604_v32 }
  0x68   : > { %640 = vmatmul.f32.vlgmr.msra.gmra.mxu2 %v602_v33  ;;  %586 = vmatpush.msra.mxu1 %v559_v57 }
  0x6a   : > { %587 = vmatpush.msra.mxu1 %v558_v59 }
  0x6c   : > { %588 = vmatpush.msra.mxu1 %v557_v61 }
  0x6e   : > { %589 = vmatpush.msra.mxu1 %v556_v62 }
  0x6f   : > { %551 = vmatmul.f32.gmra.mxu0 %v509_v34 }
  0x70   : > { %643 = vmatmul.f32.gmra.mxu2 %v603_v35  ;;  %590 = vmatpush.msra.mxu1 %v555_v63 }
  0x71   : > { %591 = vmatmul.f32.vlgmr.msra.gmra.mxu1 %v510_v0 }
  0x79   : > { %594 = vmatmul.f32.gmra.mxu1 %v511_v3 }
  0xe4   : > { %v549_v36 = vpop.f32.mrf.mxu0 }
  0xe5   : > { %v550_v42 = vadd.f32 %v1047_v37, %v549_v36 }
  0xeb   : > { %v641_v40 = vpop.f32.mrf.mxu2 }
  0xec   : > { %v552_v38 = vpop.f32.mrf.mxu0  ;;  %v642_v43 = vadd.f32 %v1048_v41, %v641_v40 }
  0xed   : > { %v553_v39 = vadd.f32 %v1047_v37, %v552_v38 }
  0xee   : > { %v592_v12 = vpop.f32.mrf.mxu1 }
  0xef   : > { %663 = vmatpush.xpose.msra.mxu3 %v553_v39  ;;  %v593_v17 = vadd.f32 %v1049_v15, %v592_v12 }
  0xf3   : > { %664 = vmatpush.xpose.msra.mxu3 %v550_v42  ;;  %v644_v44 = vpop.f32.mrf.mxu2 }
  0xf4   : > { %v645_v45 = vadd.f32 %v1048_v41, %v644_v44 }
  0xf6   : > { %665 = vmatmul.f32.vlgmr.msra.gmra.mxu3 %v642_v43  ;;  %v595_v16 = vpop.f32.mrf.mxu1 }
  0xf7   : > { %v596_v18 = vadd.f32 %v1049_v15, %v595_v16 }
  0xf9   : > { %717 = vmatpush.msrb.mxu3 %v596_v18 }
  0xfb   : > { %718 = vmatpush.msrb.mxu3 %v593_v17 }
  0xfe   : > { %668 = vmatmul.f32.gmra.mxu3 %v645_v45 }
 0x179   : > { %v666_v58 = vpop.f32.mrf.mxu3 }
 0x17a   : > { %v673_v60 = vsel %vm672_vm0, %v666_v58, -inf }
 0x17b   : > { %674 = vmax.xlane.f32.xlu0 %v673_v60 }
 0x181   : > { %v669_v1 = vpop.f32.mrf.mxu3 }
 0x182   : > { %v676_v2 = vsel %vm672_vm0, %v669_v1, -inf }
 0x183   : > { %677 = vmax.xlane.f32.xlu0 %v676_v2 }
 0x1ee   : > { %v675_v4 = vpop.xlane.xlu0 %674 }
 0x1ef   : > { %v679_v5 = vsub.f32 %v666_v58, %v675_v4 }
 0x1f1   : > { %v681_v6 = vmul.f32 1.442695, %v679_v5 }
 0x1f3   : > { %1050 = vpow2.f32 %v681_v6 }
 0x1f6   : > { %v678_v7 = vpop.xlane.xlu0 %677 }
 0x1f7   : > { %v680_v8 = vsub.f32 %v669_v1, %v678_v7 }
 0x1f9   : > { %v1051_v9 = vpop.eup %1050  ;;  %v683_v10 = vmul.f32 1.442695, %v680_v8 }
 0x1fa   : > { %v685_v11 = vsel %vm672_vm0, %v1051_v9, 0.0 }
 0x1fb   : > { %1052 = vpow2.f32 %v683_v10  ;;  %686 = vadd.xlane.f32.xlu1 %v685_v11 }
 0x201   : > { %v1053_v13 = vpop.eup %1052 }
 0x202   : > { %v688_v14 = vsel %vm672_vm0, %v1053_v13, 0.0 }
 0x203   : > { %689 = vadd.xlane.f32.xlu1 %v688_v14 }
 0x26e   : > { %v687_v19 = vpop.xlane.xlu1 %686 }
 0x26f   : > { %1054 = vrcp.f32 %v687_v19 }
 0x275   : > { %v1055_v20 = vpop.eup %1054 }
 0x276   : > { %v690_v21 = vpop.xlane.xlu1 %689  ;;  %v693_v22 = vmul.f32 %v1055_v20, %v1051_v9 }
 0x277   : > { %1056 = vrcp.f32 %v690_v21 }
 0x278   : > { %929 = vmatmul.msk.f32.vlgmr.msrb.gmra.mxu3 %vm672_vm0, %v693_v22 }
 0x27d   : > { %v1057_v23 = vpop.eup %1056 }
 0x27e   : > { %v694_v24 = vmul.f32 %v1057_v23, %v1053_v13 }
 0x280   : > { %930 = vmatmul.msk.f32.gmra.mxu3 %vm672_vm0, %v694_v24 }
 0x2fb   : > { %v720_v25 = vpop.f32.mrf.mxu3 }
 0x2fc   : > { %726 = vst [vmem:[%s501_s27] sm:$0xff] %v720_v25 }
 0x303   : > { %v723_v26 = vpop.f32.mrf.mxu3 }
 0x304   : > { %727 = vst [vmem:[%s501_s27 + $0x8] sm:$0xff] %v723_v26 }
 0x305   : > { %1265 = shalt.err (!%p1262_p0)
}
 0x306   : > { %s1339_s5 = smov 128   ;;  %s1340_s15 = smov 8  }
 0x307   : > { %958 = dma.vmem_to_hbm [thread:$0]  (%p1471_p5), %s744_s30, 256, %s746_s1, %s729_s21, %s1339_s5, %s1339_s5, %s1340_s15  }
 0x308 PF: > { %s1688_s17 = sld [smem:[#allocation21_spill]]  ;;  %p981_p3 = pnand %p911_p11, %p1436_p6 }
 0x309   : > { %s1690_s29 = sld [smem:[#allocation23_spill]] }
 0x30a   : > { %p982_p7 = pneg %p981_p3 }
 0x30e   : > { %s760_s18 = sand.u32 1, %s1688_s17  }
 0x30f   : > { %s761_s28 = scalar_lea.sflag [#allocation6], %s760_s18 }
 0x310   : > { %1307 = dma.done.wait (%p982_p7), %s761_s28, 256  }
 0x311   : > { %1309 = vsyncadd (%p982_p7), %s761_s28, 4294967040  ;;  %s30_s14 = sadd.s32 1, %s1690_s29   ;;  %s1691_s19 = sld [smem:[#allocation26_spill]] }
 0x312   : > { %p27_p9 = scmp.ge.s32.totalorder %s30_s14, 4   ;;  %s1692_s12 = sld [smem:[#allocation22_spill]] }
 0x313   : > { %s1693_s13 = sld [smem:[#allocation25_spill]]  ;;  %s1694_s30 = smov %s1316_s10 }
 0x314   : > { %s1695_s10 = smov %s1320_s11  ;;  %29 = sbr.rel (!%p27_p9) target bundleno = 16 (0x10), region = 141 }
 0x317   : > { %s1696_s11 = smov %s1691_s19 }
 0x319   :  { %767 = vsyncpa [#allocation5], 1 }
 0x31a   :  { %769 = vsyncpa [#allocation5 + $0x1], 1 }
 0x31b   :  { %770 = vsyncpa [#allocation8], 1 }
 0x31c   :  { %772 = vsyncpa [#allocation8 + $0x1], 1 }
 0x31d   :  { %773 = vsyncpa [#allocation11], 1 }
 0x31e   :  { %774 = vsyncpa [#allocation14], 1 }
 0x31f   :  { %775 = vsyncpa [#allocation6], 1 }
 0x320   :  { %777 = vsyncpa [#allocation6 + $0x1], 1 }

</bundles_post_ra>
